<compile_context>
chip_gen: v7x
topology: tpu7x:2x2x1
jax: 0.10.0
libtpu: 0.0.40
codegen_flags: <defaults>
</compile_context>

<pallas_src>
import jax
import jax.numpy as jnp
from jax.experimental import pallas as pl
from jax.experimental.pallas import tpu as pltpu


def inception_kernel(x_ref, w1f_ref, wf_ref, wc1_ref, bc1_ref, shift_ref,
                     out_ref):
    TB, L, C = x_ref.shape
    dim = wc1_ref.shape[1]
    M = TB * L

    x = x_ref[...].reshape(M, C)                       # (M, C) f32

    # Row position inside each batch element (full-shape iota -> plain selects).
    pos_c = jax.lax.broadcasted_iota(jnp.int32, (M, C), 0) % L
    pos_d = jax.lax.broadcasted_iota(jnp.int32, (M, dim), 0) % L

    def shifted(arr, d, pos, fill):
        # out[r] = arr[r + d] if (pos[r] + d) in [0, L), else fill.
        # Valid rows never cross a batch boundary; wrapped rows are masked.
        if d == 0:
            return arr
        rolled = pltpu.roll(arr, shift=(-d) % M, axis=0)
        valid = jnp.logical_and(pos + d >= 0, pos + d < L)
        return jnp.where(valid, rolled, jnp.asarray(fill, arr.dtype))

    # ---- MaxPool1d(kernel=3, stride=1, padding=1) on x (f32).
    neg_inf = float(-jnp.inf)
    mp = jnp.maximum(jnp.maximum(shifted(x, -1, pos_c, neg_inf), x),
                     shifted(x, 1, pos_c, neg_inf))

    # ---- branch1 (conv1x1 after maxpool): BN-folded weight padded to
    #      (C, C) so it writes columns [0:dim] of the concatenated slab.
    #      All biases + BN shift arrive through shift_ref.
    acc = jnp.dot(mp.astype(jnp.bfloat16), w1f_ref[...],
                  preferred_element_type=jnp.float32) + shift_ref[...]

    # ---- branch2 bottleneck: Conv1d(d_model, dim, k=1) + bias (f32 result).
    b2 = jnp.dot(x.astype(jnp.bfloat16), wc1_ref[...],
                 preferred_element_type=jnp.float32) + bc1_ref[...]

    # ---- conv2/conv3/conv4 fused: 7 shifted matmuls with (dim, C) weights
    #      whose columns are already in concatenated output order.
    for d in range(-3, 4):
        tap = shifted(b2, d, pos_d, 0.0).astype(jnp.bfloat16)
        acc = acc + jnp.dot(tap, wf_ref[d + 3],
                            preferred_element_type=jnp.float32)

    # ---- ReLU + store one lane-dense slab.
    out_ref[...] = jnp.maximum(acc, 0.0).reshape(TB, L, C).astype(out_ref.dtype)


def inception_block(x_ncl, params, *, block_batch=None):
    """x_ncl: (B, d_model, L) like PyTorch NCL.  Returns (B, d_model, L)."""
    B, C, L = x_ncl.shape
    dim = C // 4
    (w1x1, b1x1, wc1, bc1, wc3, bc3, wc5, bc5, wc7, bc7,
     bn_scale, bn_shift) = params

    scale = bn_scale.reshape(-1).astype(jnp.float32)   # (C,)
    shift = bn_shift.reshape(-1).astype(jnp.float32)   # (C,)

    # ---- Fold BN scale into the output-side weights, laid out pre-concatenated.
    w1f = jnp.zeros((C, C), jnp.float32).at[:, :dim].set(w1x1 * scale[:dim])
    wf = jnp.zeros((7, dim, C), jnp.float32)
    for j in range(3):                                  # conv2, k=3, offset j-1
        wf = wf.at[j + 2, :, dim:2 * dim].set(wc3[j] * scale[dim:2 * dim])
    for j in range(5):                                  # conv3, k=5, offset j-2
        wf = wf.at[j + 1, :, 2 * dim:3 * dim].set(wc5[j] * scale[2 * dim:3 * dim])
    for j in range(7):                                  # conv4, k=7, offset j-3
        wf = wf.at[j, :, 3 * dim:].set(wc7[j] * scale[3 * dim:])

    # Fold output-side biases + BN shift into one per-channel shift vector.
    bias_cat = jnp.concatenate([b1x1.reshape(-1), bc3.reshape(-1),
                                bc5.reshape(-1), bc7.reshape(-1)])
    shift_vec = (bias_cat * scale + shift).reshape(1, C).astype(jnp.float32)

    # bf16 MXU inputs; f32 accumulation happens in the kernel.
    w1f = w1f.astype(jnp.bfloat16)
    wf = wf.astype(jnp.bfloat16)
    wc1_b = wc1.astype(jnp.bfloat16)
    bc1_f = bc1.reshape(1, dim).astype(jnp.float32)

    # TODO(synk): for L >> d_model an NCL-native kernel (L on lanes) would drop
    #             both wrapper transposes; channels-last is kept here because it
    #             gives the MXU a large M = TB*L.
    x = jnp.transpose(x_ncl, (0, 2, 1)).astype(jnp.float32)   # (B, L, C)

    # Pack TB batch elements per grid step so M = TB*L is MXU-sized.
    if block_batch is None:
        TB = max(1, min(B, 512 // max(L, 1)))
    else:
        TB = max(1, min(B, block_batch))
    while B % TB:
        TB -= 1

    weights = [w1f, wf, wc1_b, bc1_f, shift_vec]

    def wspec(arr):
        n = arr.ndim
        return pl.BlockSpec(arr.shape, lambda i, _n=n: (0,) * _n)

    flops = 2 * B * L * (C * C + C * dim + 7 * dim * C)
    bytes_accessed = (4 * (2 * B * L * C)
                      + 2 * (w1f.size + wf.size + wc1_b.size)
                      + 4 * (bc1_f.size + shift_vec.size))

    out = pl.pallas_call(
        inception_kernel,
        out_shape=jax.ShapeDtypeStruct((B, L, C), jnp.float32),
        grid_spec=pltpu.PrefetchScalarGridSpec(
            num_scalar_prefetch=0,
            grid=(B // TB,),
            in_specs=[pl.BlockSpec((TB, L, C), lambda i: (i, 0, 0))]
                     + [wspec(w) for w in weights],
            out_specs=pl.BlockSpec((TB, L, C), lambda i: (i, 0, 0)),
        ),
        compiler_params=pltpu.CompilerParams(
            dimension_semantics=("parallel",)),
        cost_estimate=pl.CostEstimate(flops=flops, transcendentals=0,
                                      bytes_accessed=bytes_accessed),
    )(x, *weights)

    return jnp.transpose(out, (0, 2, 1))                      # back to NCL


def init_params(key, d_model):
    """Deterministic synthetic parameters mirroring the PyTorch shapes."""
    dim = d_model // 4
    ks = jax.random.split(key, 16)

    def u(k, shape, fan_in):
        bound = 1.0 / jnp.sqrt(fan_in)
        return jax.random.uniform(k, shape, jnp.float32, -bound, bound)

    # Conv weights stored kernel-friendly: 1x1 as (in, out), kxk as (k, in, out)
    w1x1 = u(ks[0], (d_model, dim), d_model)         # conv1x1 (after maxpool)
    b1x1 = u(ks[1], (1, dim), d_model)
    wc1 = u(ks[2], (d_model, dim), d_model)          # conv1 (k=1 bottleneck)
    bc1 = u(ks[3], (1, dim), d_model)
    wc3 = u(ks[4], (3, dim, dim), dim * 3)           # conv2 (k=3)
    bc3 = u(ks[5], (1, dim), dim * 3)
    wc5 = u(ks[6], (5, dim, dim), dim * 5)           # conv3 (k=5)
    bc5 = u(ks[7], (1, dim), dim * 5)
    wc7 = u(ks[8], (7, dim, dim), dim * 7)           # conv4 (k=7)
    bc7 = u(ks[9], (1, dim), dim * 7)

    # BatchNorm1d(d_model), inference mode, folded to scale/shift.
    gamma = 1.0 + 0.1 * jax.random.normal(ks[10], (d_model,), jnp.float32)
    beta = 0.1 * jax.random.normal(ks[11], (d_model,), jnp.float32)
    rmean = 0.1 * jax.random.normal(ks[12], (d_model,), jnp.float32)
    rvar = 1.0 + 0.1 * jnp.abs(jax.random.normal(ks[13], (d_model,), jnp.float32))
    eps = 1e-5
    bn_scale = (gamma / jnp.sqrt(rvar + eps)).reshape(1, d_model)
    bn_shift = (beta - rmean * (gamma / jnp.sqrt(rvar + eps))).reshape(1, d_model)

    return (w1x1, b1x1, wc1, bc1, wc3, bc3, wc5, bc5, wc7, bc7,
            bn_scale, bn_shift)


def reference_forward(x_ncl, params):
    """Plain-JAX f32 reference using PyTorch conv conventions (NCL / OIK)."""
    (w1x1, b1x1, wc1, bc1, wc3, bc3, wc5, bc5, wc7, bc7,
     bn_scale, bn_shift) = params

    def conv1d(x, w_store, b, pad):
        if w_store.ndim == 2:                       # (in, out) -> (out, in, 1)
            w = w_store.T[:, :, None]
        else:                                       # (k, in, out) -> (out, in, k)
            w = jnp.transpose(w_store, (2, 1, 0))
        y = jax.lax.conv_general_dilated(
            x, w, window_strides=(1,), padding=[(pad, pad)],
            dimension_numbers=('NCH', 'OIH', 'NCH'))
        return y + b.reshape(1, -1, 1)

    mp = jax.lax.reduce_window(x_ncl, -jnp.inf, jax.lax.max,
                               (1, 1, 3), (1, 1, 1),
                               [(0, 0), (0, 0), (1, 1)])
    branch1 = conv1d(mp, w1x1, b1x1, 0)
    branch2 = conv1d(x_ncl, wc1, bc1, 0)
    b21 = conv1d(branch2, wc3, bc3, 1)
    b22 = conv1d(branch2, wc5, bc5, 2)
    b23 = conv1d(branch2, wc7, bc7, 3)
    out = jnp.concatenate([branch1, b21, b22, b23], axis=1)
    out = out * bn_scale.reshape(1, -1, 1) + bn_shift.reshape(1, -1, 1)
    return jnp.maximum(out, 0.0)


if __name__ == "__main__":
    B, d_model, L = 2, 32, 16
    key = jax.random.PRNGKey(0)
    kx, kp = jax.random.split(key)

    x = jax.random.normal(kx, (B, d_model, L), jnp.float32)   # PyTorch NCL
    params = init_params(kp, d_model)

    fn = jax.jit(inception_block)
    out = jax.block_until_ready(fn(x, params))

    ref = jax.block_until_ready(reference_forward(x, params))
    assert out.shape == (B, d_model, L)
    # bf16 MXU inputs with f32 accumulation -> a few e-3 error vs f32 reference.
    assert jnp.allclose(out, ref, atol=3e-2, rtol=3e-2)

    print("KERNEL_OK")
</pallas_src>

<mosaic_0001>
module attributes {stable_mosaic.version = 11 : i64} {
  func.func @inception_kernel(%arg0: i32, %arg1: memref<2x16x32xf32, #tpu.memory_space<vmem>>, %arg2: memref<32x32xbf16, #tpu.memory_space<vmem>>, %arg3: memref<7x8x32xbf16, #tpu.memory_space<vmem>>, %arg4: memref<32x8xbf16, #tpu.memory_space<vmem>>, %arg5: memref<1x8xf32, #tpu.memory_space<vmem>>, %arg6: memref<1x32xf32, #tpu.memory_space<vmem>>, %arg7: memref<2x16x32xf32, #tpu.memory_space<vmem>>) attributes {dimension_semantics = [#tpu.dimension_semantics<parallel>], iteration_bounds = array<i64: 1>, scalar_prefetch = 0 : i64, scratch_operands = 0 : i64, tpu.core_type = #tpu.core_type<tc>, window_params = [{transform_indices = @transform_0, window_bounds = array<i64: 2, 16, 32>}, {pipeline_mode = #tpu.pipeline_mode<synchronous>, transform_indices = @transform_1, window_bounds = array<i64: 32, 32>}, {pipeline_mode = #tpu.pipeline_mode<synchronous>, transform_indices = @transform_2, window_bounds = array<i64: 7, 8, 32>}, {pipeline_mode = #tpu.pipeline_mode<synchronous>, transform_indices = @transform_3, window_bounds = array<i64: 32, 8>}, {pipeline_mode = #tpu.pipeline_mode<synchronous>, transform_indices = @transform_4, window_bounds = array<i64: 1, 8>}, {pipeline_mode = #tpu.pipeline_mode<synchronous>, transform_indices = @transform_5, window_bounds = array<i64: 1, 32>}, {transform_indices = @transform_6, window_bounds = array<i64: 2, 16, 32>}]} {
    %c0 = arith.constant 0 : index
    %c0_0 = arith.constant 0 : index
    %c0_1 = arith.constant 0 : index
    %0 = vector.load %arg1[%c0, %c0_0, %c0_1] : memref<2x16x32xf32, #tpu.memory_space<vmem>>, vector<2x16x32xf32>
    %1 = vector.shape_cast %0 : vector<2x16x32xf32> to vector<32x32xf32>
    %2 = tpu.iota {dimensions = array<i32: 0>} : vector<32x32xi32>
    %c16_i32 = arith.constant 16 : i32
    %c0_i32 = arith.constant 0 : i32
    %3 = arith.cmpi eq, %c16_i32, %c0_i32 : i32
    %c1_i32 = arith.constant 1 : i32
    %4 = arith.select %3, %c1_i32, %c16_i32 : i32
    %5 = vector.broadcast %4 : i32 to vector<32x32xi32>
    %6 = arith.remsi %2, %5 : vector<32x32xi32>
    %c0_i32_2 = arith.constant 0 : i32
    %7 = vector.broadcast %c0_i32_2 : i32 to vector<32x32xi32>
    %8 = arith.cmpi ne, %6, %7 : vector<32x32xi32>
    %c0_i32_3 = arith.constant 0 : i32
    %9 = vector.broadcast %c0_i32_3 : i32 to vector<32x32xi32>
    %10 = arith.cmpi slt, %6, %9 : vector<32x32xi32>
    %c0_i32_4 = arith.constant 0 : i32
    %11 = arith.cmpi slt, %4, %c0_i32_4 : i32
    %12 = vector.broadcast %11 : i1 to vector<32x32xi1>
    %13 = vector.broadcast %12 : vector<32x32xi1> to vector<32x32xi1>
    %14 = arith.xori %10, %13 : vector<32x32xi1>
    %15 = arith.andi %14, %8 : vector<32x32xi1>
    %16 = vector.broadcast %4 : i32 to vector<32x32xi32>
    %17 = arith.addi %6, %16 : vector<32x32xi32>
    %18 = arith.select %15, %17, %6 : vector<32x32xi1>, vector<32x32xi32>
    %19 = tpu.iota {dimensions = array<i32: 0>} : vector<32x8xi32>
    %c16_i32_5 = arith.constant 16 : i32
    %c0_i32_6 = arith.constant 0 : i32
    %20 = arith.cmpi eq, %c16_i32_5, %c0_i32_6 : i32
    %c1_i32_7 = arith.constant 1 : i32
    %21 = arith.select %20, %c1_i32_7, %c16_i32_5 : i32
    %22 = vector.broadcast %21 : i32 to vector<32x8xi32>
    %23 = arith.remsi %19, %22 : vector<32x8xi32>
    %c0_i32_8 = arith.constant 0 : i32
    %24 = vector.broadcast %c0_i32_8 : i32 to vector<32x8xi32>
    %25 = arith.cmpi ne, %23, %24 : vector<32x8xi32>
    %c0_i32_9 = arith.constant 0 : i32
    %26 = vector.broadcast %c0_i32_9 : i32 to vector<32x8xi32>
    %27 = arith.cmpi slt, %23, %26 : vector<32x8xi32>
    %c0_i32_10 = arith.constant 0 : i32
    %28 = arith.cmpi slt, %21, %c0_i32_10 : i32
    %29 = vector.broadcast %28 : i1 to vector<32x8xi1>
    %30 = vector.broadcast %29 : vector<32x8xi1> to vector<32x8xi1>
    %31 = arith.xori %27, %30 : vector<32x8xi1>
    %32 = arith.andi %31, %25 : vector<32x8xi1>
    %33 = vector.broadcast %21 : i32 to vector<32x8xi32>
    %34 = arith.addi %23, %33 : vector<32x8xi32>
    %35 = arith.select %32, %34, %23 : vector<32x8xi1>, vector<32x8xi32>
    %c1_i32_11 = arith.constant 1 : i32
    %36 = tpu.dynamic_rotate %1 by %c1_i32_11 dim 0 : vector<32x32xf32>, i32 -> vector<32x32xf32>
    %c-1_i32 = arith.constant -1 : i32
    %37 = vector.broadcast %c-1_i32 : i32 to vector<32x32xi32>
    %38 = arith.addi %18, %37 : vector<32x32xi32>
    %c0_i32_12 = arith.constant 0 : i32
    %39 = vector.broadcast %c0_i32_12 : i32 to vector<32x32xi32>
    %40 = arith.cmpi sge, %38, %39 : vector<32x32xi32>
    %c-1_i32_13 = arith.constant -1 : i32
    %41 = vector.broadcast %c-1_i32_13 : i32 to vector<32x32xi32>
    %42 = arith.addi %18, %41 : vector<32x32xi32>
    %c16_i32_14 = arith.constant 16 : i32
    %43 = vector.broadcast %c16_i32_14 : i32 to vector<32x32xi32>
    %44 = arith.cmpi slt, %42, %43 : vector<32x32xi32>
    %45 = arith.andi %40, %44 : vector<32x32xi1>
    %cst = arith.constant 0xFF800000 : f32
    %46 = vector.broadcast %cst : f32 to vector<32x32xf32>
    %47 = arith.select %45, %36, %46 : vector<32x32xi1>, vector<32x32xf32>
    %48 = arith.maximumf %47, %1 : vector<32x32xf32>
    %c31_i32 = arith.constant 31 : i32
    %49 = tpu.dynamic_rotate %1 by %c31_i32 dim 0 : vector<32x32xf32>, i32 -> vector<32x32xf32>
    %c1_i32_15 = arith.constant 1 : i32
    %50 = vector.broadcast %c1_i32_15 : i32 to vector<32x32xi32>
    %51 = arith.addi %18, %50 : vector<32x32xi32>
    %c0_i32_16 = arith.constant 0 : i32
    %52 = vector.broadcast %c0_i32_16 : i32 to vector<32x32xi32>
    %53 = arith.cmpi sge, %51, %52 : vector<32x32xi32>
    %c1_i32_17 = arith.constant 1 : i32
    %54 = vector.broadcast %c1_i32_17 : i32 to vector<32x32xi32>
    %55 = arith.addi %18, %54 : vector<32x32xi32>
    %c16_i32_18 = arith.constant 16 : i32
    %56 = vector.broadcast %c16_i32_18 : i32 to vector<32x32xi32>
    %57 = arith.cmpi slt, %55, %56 : vector<32x32xi32>
    %58 = arith.andi %53, %57 : vector<32x32xi1>
    %cst_19 = arith.constant 0xFF800000 : f32
    %59 = vector.broadcast %cst_19 : f32 to vector<32x32xf32>
    %60 = arith.select %58, %49, %59 : vector<32x32xi1>, vector<32x32xf32>
    %61 = arith.maximumf %48, %60 : vector<32x32xf32>
    %62 = arith.truncf %61 : vector<32x32xf32> to vector<32x32xbf16>
    %c0_20 = arith.constant 0 : index
    %c0_21 = arith.constant 0 : index
    %63 = vector.load %arg2[%c0_20, %c0_21] : memref<32x32xbf16, #tpu.memory_space<vmem>>, vector<32x32xbf16>
    %cst_22 = arith.constant dense<0.000000e+00> : vector<32x32xf32>
    %64 = tpu.matmul %62, %63, %cst_22 {dimension_numbers = #tpu.dot_dimension_numbers<[1], [0], [0], [1], [0, 0, 1, 1], [], []>} : vector<32x32xbf16>, vector<32x32xbf16>, vector<32x32xf32> -> vector<32x32xf32>
    %c0_23 = arith.constant 0 : index
    %c0_24 = arith.constant 0 : index
    %65 = vector.load %arg6[%c0_23, %c0_24] : memref<1x32xf32, #tpu.memory_space<vmem>>, vector<1x32xf32>
    %66 = vector.broadcast %65 : vector<1x32xf32> to vector<32x32xf32>
    %67 = arith.addf %64, %66 : vector<32x32xf32>
    %68 = arith.truncf %1 : vector<32x32xf32> to vector<32x32xbf16>
    %c0_25 = arith.constant 0 : index
    %c0_26 = arith.constant 0 : index
    %69 = vector.load %arg4[%c0_25, %c0_26] : memref<32x8xbf16, #tpu.memory_space<vmem>>, vector<32x8xbf16>
    %cst_27 = arith.constant dense<0.000000e+00> : vector<32x8xf32>
    %70 = tpu.matmul %68, %69, %cst_27 {dimension_numbers = #tpu.dot_dimension_numbers<[1], [0], [0], [1], [0, 0, 1, 1], [], []>} : vector<32x32xbf16>, vector<32x8xbf16>, vector<32x8xf32> -> vector<32x8xf32>
    %c0_28 = arith.constant 0 : index
    %c0_29 = arith.constant 0 : index
    %71 = vector.load %arg5[%c0_28, %c0_29] : memref<1x8xf32, #tpu.memory_space<vmem>>, vector<1x8xf32>
    %72 = vector.broadcast %71 : vector<1x8xf32> to vector<32x8xf32>
    %73 = arith.addf %70, %72 : vector<32x8xf32>
    %c3_i32 = arith.constant 3 : i32
    %74 = tpu.dynamic_rotate %73 by %c3_i32 dim 0 : vector<32x8xf32>, i32 -> vector<32x8xf32>
    %c-3_i32 = arith.constant -3 : i32
    %75 = vector.broadcast %c-3_i32 : i32 to vector<32x8xi32>
    %76 = arith.addi %35, %75 : vector<32x8xi32>
    %c0_i32_30 = arith.constant 0 : i32
    %77 = vector.broadcast %c0_i32_30 : i32 to vector<32x8xi32>
    %78 = arith.cmpi sge, %76, %77 : vector<32x8xi32>
    %c-3_i32_31 = arith.constant -3 : i32
    %79 = vector.broadcast %c-3_i32_31 : i32 to vector<32x8xi32>
    %80 = arith.addi %35, %79 : vector<32x8xi32>
    %c16_i32_32 = arith.constant 16 : i32
    %81 = vector.broadcast %c16_i32_32 : i32 to vector<32x8xi32>
    %82 = arith.cmpi slt, %80, %81 : vector<32x8xi32>
    %83 = arith.andi %78, %82 : vector<32x8xi1>
    %cst_33 = arith.constant 0.000000e+00 : f32
    %84 = vector.broadcast %cst_33 : f32 to vector<32x8xf32>
    %85 = arith.select %83, %74, %84 : vector<32x8xi1>, vector<32x8xf32>
    %86 = arith.truncf %85 : vector<32x8xf32> to vector<32x8xbf16>
    %c0_34 = arith.constant 0 : index
    %c0_35 = arith.constant 0 : index
    %c0_36 = arith.constant 0 : index
    %87 = vector.load %arg3[%c0_34, %c0_35, %c0_36] : memref<7x8x32xbf16, #tpu.memory_space<vmem>>, vector<1x8x32xbf16>
    %88 = vector.shape_cast %87 : vector<1x8x32xbf16> to vector<8x32xbf16>
    %cst_37 = arith.constant dense<0.000000e+00> : vector<32x32xf32>
    %89 = tpu.matmul %86, %88, %cst_37 {dimension_numbers = #tpu.dot_dimension_numbers<[1], [0], [0], [1], [0, 0, 1, 1], [], []>} : vector<32x8xbf16>, vector<8x32xbf16>, vector<32x32xf32> -> vector<32x32xf32>
    %90 = arith.addf %67, %89 : vector<32x32xf32>
    %c2_i32 = arith.constant 2 : i32
    %91 = tpu.dynamic_rotate %73 by %c2_i32 dim 0 : vector<32x8xf32>, i32 -> vector<32x8xf32>
    %c-2_i32 = arith.constant -2 : i32
    %92 = vector.broadcast %c-2_i32 : i32 to vector<32x8xi32>
    %93 = arith.addi %35, %92 : vector<32x8xi32>
    %c0_i32_38 = arith.constant 0 : i32
    %94 = vector.broadcast %c0_i32_38 : i32 to vector<32x8xi32>
    %95 = arith.cmpi sge, %93, %94 : vector<32x8xi32>
    %c-2_i32_39 = arith.constant -2 : i32
    %96 = vector.broadcast %c-2_i32_39 : i32 to vector<32x8xi32>
    %97 = arith.addi %35, %96 : vector<32x8xi32>
    %c16_i32_40 = arith.constant 16 : i32
    %98 = vector.broadcast %c16_i32_40 : i32 to vector<32x8xi32>
    %99 = arith.cmpi slt, %97, %98 : vector<32x8xi32>
    %100 = arith.andi %95, %99 : vector<32x8xi1>
    %cst_41 = arith.constant 0.000000e+00 : f32
    %101 = vector.broadcast %cst_41 : f32 to vector<32x8xf32>
    %102 = arith.select %100, %91, %101 : vector<32x8xi1>, vector<32x8xf32>
    %103 = arith.truncf %102 : vector<32x8xf32> to vector<32x8xbf16>
    %c1 = arith.constant 1 : index
    %c0_42 = arith.constant 0 : index
    %c0_43 = arith.constant 0 : index
    %104 = vector.load %arg3[%c1, %c0_42, %c0_43] : memref<7x8x32xbf16, #tpu.memory_space<vmem>>, vector<1x8x32xbf16>
    %105 = vector.shape_cast %104 : vector<1x8x32xbf16> to vector<8x32xbf16>
    %cst_44 = arith.constant dense<0.000000e+00> : vector<32x32xf32>
    %106 = tpu.matmul %103, %105, %cst_44 {dimension_numbers = #tpu.dot_dimension_numbers<[1], [0], [0], [1], [0, 0, 1, 1], [], []>} : vector<32x8xbf16>, vector<8x32xbf16>, vector<32x32xf32> -> vector<32x32xf32>
    %107 = arith.addf %90, %106 : vector<32x32xf32>
    %c1_i32_45 = arith.constant 1 : i32
    %108 = tpu.dynamic_rotate %73 by %c1_i32_45 dim 0 : vector<32x8xf32>, i32 -> vector<32x8xf32>
    %c-1_i32_46 = arith.constant -1 : i32
    %109 = vector.broadcast %c-1_i32_46 : i32 to vector<32x8xi32>
    %110 = arith.addi %35, %109 : vector<32x8xi32>
    %c0_i32_47 = arith.constant 0 : i32
    %111 = vector.broadcast %c0_i32_47 : i32 to vector<32x8xi32>
    %112 = arith.cmpi sge, %110, %111 : vector<32x8xi32>
    %c-1_i32_48 = arith.constant -1 : i32
    %113 = vector.broadcast %c-1_i32_48 : i32 to vector<32x8xi32>
    %114 = arith.addi %35, %113 : vector<32x8xi32>
    %c16_i32_49 = arith.constant 16 : i32
    %115 = vector.broadcast %c16_i32_49 : i32 to vector<32x8xi32>
    %116 = arith.cmpi slt, %114, %115 : vector<32x8xi32>
    %117 = arith.andi %112, %116 : vector<32x8xi1>
    %cst_50 = arith.constant 0.000000e+00 : f32
    %118 = vector.broadcast %cst_50 : f32 to vector<32x8xf32>
    %119 = arith.select %117, %108, %118 : vector<32x8xi1>, vector<32x8xf32>
    %120 = arith.truncf %119 : vector<32x8xf32> to vector<32x8xbf16>
    %c2 = arith.constant 2 : index
    %c0_51 = arith.constant 0 : index
    %c0_52 = arith.constant 0 : index
    %121 = vector.load %arg3[%c2, %c0_51, %c0_52] : memref<7x8x32xbf16, #tpu.memory_space<vmem>>, vector<1x8x32xbf16>
    %122 = vector.shape_cast %121 : vector<1x8x32xbf16> to vector<8x32xbf16>
    %cst_53 = arith.constant dense<0.000000e+00> : vector<32x32xf32>
    %123 = tpu.matmul %120, %122, %cst_53 {dimension_numbers = #tpu.dot_dimension_numbers<[1], [0], [0], [1], [0, 0, 1, 1], [], []>} : vector<32x8xbf16>, vector<8x32xbf16>, vector<32x32xf32> -> vector<32x32xf32>
    %124 = arith.addf %107, %123 : vector<32x32xf32>
    %125 = arith.truncf %73 : vector<32x8xf32> to vector<32x8xbf16>
    %c3 = arith.constant 3 : index
    %c0_54 = arith.constant 0 : index
    %c0_55 = arith.constant 0 : index
    %126 = vector.load %arg3[%c3, %c0_54, %c0_55] : memref<7x8x32xbf16, #tpu.memory_space<vmem>>, vector<1x8x32xbf16>
    %127 = vector.shape_cast %126 : vector<1x8x32xbf16> to vector<8x32xbf16>
    %cst_56 = arith.constant dense<0.000000e+00> : vector<32x32xf32>
    %128 = tpu.matmul %125, %127, %cst_56 {dimension_numbers = #tpu.dot_dimension_numbers<[1], [0], [0], [1], [0, 0, 1, 1], [], []>} : vector<32x8xbf16>, vector<8x32xbf16>, vector<32x32xf32> -> vector<32x32xf32>
    %129 = arith.addf %124, %128 : vector<32x32xf32>
    %c31_i32_57 = arith.constant 31 : i32
    %130 = tpu.dynamic_rotate %73 by %c31_i32_57 dim 0 : vector<32x8xf32>, i32 -> vector<32x8xf32>
    %c1_i32_58 = arith.constant 1 : i32
    %131 = vector.broadcast %c1_i32_58 : i32 to vector<32x8xi32>
    %132 = arith.addi %35, %131 : vector<32x8xi32>
    %c0_i32_59 = arith.constant 0 : i32
    %133 = vector.broadcast %c0_i32_59 : i32 to vector<32x8xi32>
    %134 = arith.cmpi sge, %132, %133 : vector<32x8xi32>
    %c1_i32_60 = arith.constant 1 : i32
    %135 = vector.broadcast %c1_i32_60 : i32 to vector<32x8xi32>
    %136 = arith.addi %35, %135 : vector<32x8xi32>
    %c16_i32_61 = arith.constant 16 : i32
    %137 = vector.broadcast %c16_i32_61 : i32 to vector<32x8xi32>
    %138 = arith.cmpi slt, %136, %137 : vector<32x8xi32>
    %139 = arith.andi %134, %138 : vector<32x8xi1>
    %cst_62 = arith.constant 0.000000e+00 : f32
    %140 = vector.broadcast %cst_62 : f32 to vector<32x8xf32>
    %141 = arith.select %139, %130, %140 : vector<32x8xi1>, vector<32x8xf32>
    %142 = arith.truncf %141 : vector<32x8xf32> to vector<32x8xbf16>
    %c4 = arith.constant 4 : index
    %c0_63 = arith.constant 0 : index
    %c0_64 = arith.constant 0 : index
    %143 = vector.load %arg3[%c4, %c0_63, %c0_64] : memref<7x8x32xbf16, #tpu.memory_space<vmem>>, vector<1x8x32xbf16>
    %144 = vector.shape_cast %143 : vector<1x8x32xbf16> to vector<8x32xbf16>
    %cst_65 = arith.constant dense<0.000000e+00> : vector<32x32xf32>
    %145 = tpu.matmul %142, %144, %cst_65 {dimension_numbers = #tpu.dot_dimension_numbers<[1], [0], [0], [1], [0, 0, 1, 1], [], []>} : vector<32x8xbf16>, vector<8x32xbf16>, vector<32x32xf32> -> vector<32x32xf32>
    %146 = arith.addf %129, %145 : vector<32x32xf32>
    %c30_i32 = arith.constant 30 : i32
    %147 = tpu.dynamic_rotate %73 by %c30_i32 dim 0 : vector<32x8xf32>, i32 -> vector<32x8xf32>
    %c2_i32_66 = arith.constant 2 : i32
    %148 = vector.broadcast %c2_i32_66 : i32 to vector<32x8xi32>
    %149 = arith.addi %35, %148 : vector<32x8xi32>
    %c0_i32_67 = arith.constant 0 : i32
    %150 = vector.broadcast %c0_i32_67 : i32 to vector<32x8xi32>
    %151 = arith.cmpi sge, %149, %150 : vector<32x8xi32>
    %c2_i32_68 = arith.constant 2 : i32
    %152 = vector.broadcast %c2_i32_68 : i32 to vector<32x8xi32>
    %153 = arith.addi %35, %152 : vector<32x8xi32>
    %c16_i32_69 = arith.constant 16 : i32
    %154 = vector.broadcast %c16_i32_69 : i32 to vector<32x8xi32>
    %155 = arith.cmpi slt, %153, %154 : vector<32x8xi32>
    %156 = arith.andi %151, %155 : vector<32x8xi1>
    %cst_70 = arith.constant 0.000000e+00 : f32
    %157 = vector.broadcast %cst_70 : f32 to vector<32x8xf32>
    %158 = arith.select %156, %147, %157 : vector<32x8xi1>, vector<32x8xf32>
    %159 = arith.truncf %158 : vector<32x8xf32> to vector<32x8xbf16>
    %c5 = arith.constant 5 : index
    %c0_71 = arith.constant 0 : index
    %c0_72 = arith.constant 0 : index
    %160 = vector.load %arg3[%c5, %c0_71, %c0_72] : memref<7x8x32xbf16, #tpu.memory_space<vmem>>, vector<1x8x32xbf16>
    %161 = vector.shape_cast %160 : vector<1x8x32xbf16> to vector<8x32xbf16>
    %cst_73 = arith.constant dense<0.000000e+00> : vector<32x32xf32>
    %162 = tpu.matmul %159, %161, %cst_73 {dimension_numbers = #tpu.dot_dimension_numbers<[1], [0], [0], [1], [0, 0, 1, 1], [], []>} : vector<32x8xbf16>, vector<8x32xbf16>, vector<32x32xf32> -> vector<32x32xf32>
    %163 = arith.addf %146, %162 : vector<32x32xf32>
    %c29_i32 = arith.constant 29 : i32
    %164 = tpu.dynamic_rotate %73 by %c29_i32 dim 0 : vector<32x8xf32>, i32 -> vector<32x8xf32>
    %c3_i32_74 = arith.constant 3 : i32
    %165 = vector.broadcast %c3_i32_74 : i32 to vector<32x8xi32>
    %166 = arith.addi %35, %165 : vector<32x8xi32>
    %c0_i32_75 = arith.constant 0 : i32
    %167 = vector.broadcast %c0_i32_75 : i32 to vector<32x8xi32>
    %168 = arith.cmpi sge, %166, %167 : vector<32x8xi32>
    %c3_i32_76 = arith.constant 3 : i32
    %169 = vector.broadcast %c3_i32_76 : i32 to vector<32x8xi32>
    %170 = arith.addi %35, %169 : vector<32x8xi32>
    %c16_i32_77 = arith.constant 16 : i32
    %171 = vector.broadcast %c16_i32_77 : i32 to vector<32x8xi32>
    %172 = arith.cmpi slt, %170, %171 : vector<32x8xi32>
    %173 = arith.andi %168, %172 : vector<32x8xi1>
    %cst_78 = arith.constant 0.000000e+00 : f32
    %174 = vector.broadcast %cst_78 : f32 to vector<32x8xf32>
    %175 = arith.select %173, %164, %174 : vector<32x8xi1>, vector<32x8xf32>
    %176 = arith.truncf %175 : vector<32x8xf32> to vector<32x8xbf16>
    %c6 = arith.constant 6 : index
    %c0_79 = arith.constant 0 : index
    %c0_80 = arith.constant 0 : index
    %177 = vector.load %arg3[%c6, %c0_79, %c0_80] : memref<7x8x32xbf16, #tpu.memory_space<vmem>>, vector<1x8x32xbf16>
    %178 = vector.shape_cast %177 : vector<1x8x32xbf16> to vector<8x32xbf16>
    %cst_81 = arith.constant dense<0.000000e+00> : vector<32x32xf32>
    %179 = tpu.matmul %176, %178, %cst_81 {dimension_numbers = #tpu.dot_dimension_numbers<[1], [0], [0], [1], [0, 0, 1, 1], [], []>} : vector<32x8xbf16>, vector<8x32xbf16>, vector<32x32xf32> -> vector<32x32xf32>
    %180 = arith.addf %163, %179 : vector<32x32xf32>
    %cst_82 = arith.constant 0.000000e+00 : f32
    %181 = vector.broadcast %cst_82 : f32 to vector<32x32xf32>
    %182 = arith.maximumf %180, %181 : vector<32x32xf32>
    %183 = vector.shape_cast %182 : vector<32x32xf32> to vector<2x16x32xf32>
    %c0_83 = arith.constant 0 : index
    %c0_84 = arith.constant 0 : index
    %c0_85 = arith.constant 0 : index
    %184 = vector.load %arg7[%c0_83, %c0_84, %c0_85] : memref<2x16x32xf32, #tpu.memory_space<vmem>>, vector<2x16x32xf32>
    tpu.vector_store %arg7[%c0_83, %c0_84, %c0_85], %183 {strides = array<i32>} : memref<2x16x32xf32, #tpu.memory_space<vmem>>, vector<2x16x32xf32>,
    return
  }
  func.func @transform_0(%arg0: i32) -> (i32, i32, i32) {
    %c0_i32 = arith.constant 0 : i32
    %c0_i32_0 = arith.constant 0 : i32
    %c0_i32_1 = arith.constant 0 : i32
    return %arg0, %c0_i32, %c0_i32_0 : i32, i32, i32
  }
  func.func @transform_1(%arg0: i32) -> (i32, i32) {
    %c0_i32 = arith.constant 0 : i32
    %c0_i32_0 = arith.constant 0 : i32
    %c0_i32_1 = arith.constant 0 : i32
    return %c0_i32, %c0_i32_0 : i32, i32
  }
  func.func @transform_2(%arg0: i32) -> (i32, i32, i32) {
    %c0_i32 = arith.constant 0 : i32
    %c0_i32_0 = arith.constant 0 : i32
    %c0_i32_1 = arith.constant 0 : i32
    %c0_i32_2 = arith.constant 0 : i32
    return %c0_i32, %c0_i32_0, %c0_i32_1 : i32, i32, i32
  }
  func.func @transform_3(%arg0: i32) -> (i32, i32) {
    %c0_i32 = arith.constant 0 : i32
    %c0_i32_0 = arith.constant 0 : i32
    %c0_i32_1 = arith.constant 0 : i32
    return %c0_i32, %c0_i32_0 : i32, i32
  }
  func.func @transform_4(%arg0: i32) -> (i32, i32) {
    %c0_i32 = arith.constant 0 : i32
    %c0_i32_0 = arith.constant 0 : i32
    %c0_i32_1 = arith.constant 0 : i32
    return %c0_i32, %c0_i32_0 : i32, i32
  }
  func.func @transform_5(%arg0: i32) -> (i32, i32) {
    %c0_i32 = arith.constant 0 : i32
    %c0_i32_0 = arith.constant 0 : i32
    %c0_i32_1 = arith.constant 0 : i32
    return %c0_i32, %c0_i32_0 : i32, i32
  }
  func.func @transform_6(%arg0: i32) -> (i32, i32, i32) {
    %c0_i32 = arith.constant 0 : i32
    %c0_i32_0 = arith.constant 0 : i32
    %c0_i32_1 = arith.constant 0 : i32
    return %arg0, %c0_i32, %c0_i32_0 : i32, i32, i32
  }
}

</mosaic_0001>

<bundles_post_ra>
// kernel: inception_block.1
= control target key start
LH: loop header
LB: loop body
LE: loop exit
PB: predicated region body
PF: predicated region fallthrough
CT: control target
= control target key end

     0   :  { %v29_v1 = vlaneseq  ;;  %s1478_s0 = inlined_call_operand.vmem [shape: f32[2,16,32], index: 0, kind: input, shape index: {}]   ;;  %s1479_s1 = inlined_call_operand.vmem [shape: bf16[32,32], index: 1, kind: input, shape index: {}]   ;;  %s1480_s2 = inlined_call_operand.vmem [shape: bf16[7,8,32], index: 2, kind: input, shape index: {}]   ;;  %s1481_s3 = inlined_call_operand.vmem [shape: bf16[32,8], index: 3, kind: input, shape index: {}]   ;;  %s1482_s4 = inlined_call_operand.vmem [shape: f32[1,8], index: 4, kind: input, shape index: {}]   ;;  %s1483_s5 = inlined_call_operand.vmem [shape: f32[1,32], index: 5, kind: input, shape index: {}]   ;;  %s1484_s6 = inlined_call_operand.hbm [shape: f32[2,16,32], index: 6, kind: output, shape index: {}]  }
   0x1   :  { %v1095_v0 = vld [vmem:[%s1479_s1] sm:$0xff]   ;;  %v1096_v2 = vld [vmem:[%s1479_s1 + $0x8] sm:$0xff]   ;;  %v1180_v5 = vld [vmem:[%s1478_s0 + $0x10] sm:$0xff] }
   0x2   :  { %995 = vmatprep.subr.bf16.mxu1 %v1095_v0  ;;  %v1170_v3 = vld [vmem:[%s1478_s0] sm:$0xff]  ;;  %v1175_v4 = vld [vmem:[%s1478_s0 + $0x8] sm:$0xff]  ;;  %v1182_v6 = vshrl.u32 %v29_v1, 7  ;;  %v1187_v7 = vld [vmem:[%s1478_s0 + $0x18] sm:$0xff]  ;;  %v117_v17 = vrot.slane %v1180_v5, 1 }
   0x3   :  { %996 = vmatpush3.bf16.msra.mxu1 %v1095_v0  ;;  %v82_v8 = vrot.slane %v1170_v3, 7  ;;  %v83_v9 = vrot.slane %v1175_v4, 7  ;;  %v115_v10 = vrot.slane %v1170_v3, 1  ;;  %v116_v11 = vrot.slane %v1175_v4, 1  ;;  %v1097_v12 = vld [vmem:[%s1481_s3] sm:$0xff]  }
   0x4   :  { %997 = vmatprep.subr.bf16.mxu1 %v1096_v2  ;;  %v31_v13 = vadd.s32 8, %v1182_v6  ;;  %v1198_v14 = vand.u32 15, %v1182_v6  ;;  %v85_v15 = vrot.slane %v1187_v7, 7  ;;  %vm86_vm0 = vcmp.lt.s32.totalorder %v1182_v6, 1 }
   0x5   :  { %v89_v16 = vsel %vm86_vm0, %v82_v8, %v83_v9  ;;  %vm119_vm1 = vcmp.lt.s32.totalorder %v1182_v6, 7  ;;  %v32_v18 = vadd.s32 16, %v1182_v6  ;;  %v33_v24 = vadd.s32 24, %v1182_v6 }
   0x6   :  { %v1207_v19 = vand.u32 15, %v31_v13  ;;  %v90_v20 = vsel %vm86_vm0, %v85_v15, %v82_v8  ;;  %v1212_v21 = vadd.s32 4294967295, %v1198_v14  ;;  %v112_v22 = vmax.f32 %v89_v16, %v1175_v4 }
   0x7   :  { %998 = vmatpush3.bf16.msra.mxu1 %v1096_v2  ;;  %v121_v23 = vsel %vm119_vm1, %v116_v11, %v117_v17  ;;  %v52_v25 = vand.u32 15, %v32_v18 }
   0x8   :  { %11 = vsyncpa [#allocation3], 0  ;;  %vm95_vm2 = vcmp.ge.s32.totalorder %v1212_v21, 0  ;;  %v1220_v26 = vadd.s32 1, %v1207_v19  ;;  %1003 = vmatprep.subr.bf16.mxu1 %v1097_v12  ;;  %v84_v27 = vrot.slane %v1180_v5, 7  ;;  %v118_v28 = vrot.slane %v1187_v7, 1 }
   0x9   :  { %v107_v29 = vsel %vm95_vm2, %v90_v20, -inf  ;;  %v122_v30 = vsel %vm119_vm1, %v115_v10, %v116_v11  ;;  %v1228_v31 = vand.u32 15, %v33_v24  ;;  %v1230_v32 = vadd.s32 4294967295, %v52_v25  ;;  %v1098_v51 = vld [vmem:[%s1481_s3 + $0x8] sm:$0xff]   ;;  %v340_v54 = vld [vmem:[%s1480_s2] sm:$0xf] }
   0xa   :  { %v111_v33 = vmax.f32 %v107_v29, %v1170_v3  ;;  %vm133_vm3 = vcmp.lt.s32.totalorder %v1220_v26, 16  ;;  %v87_v34 = vsel %vm86_vm0, %v84_v27, %v85_v15  ;;  %v88_v35 = vsel %vm86_vm0, %v83_v9, %v84_v27  ;;  %v951_v53 = vld [vmem:[%s1480_s2 + $0x8] sm:$0xf]  ;;  %v954_v57 = vld [vmem:[%s1480_s2 + $0xc] sm:$0xf]  ;;  %s1123_s26 = smov [#allocation2]  }
   0xb   :  { %v141_v36 = vsel %vm133_vm3, %v121_v23, -inf  ;;  %vm1485_vm4 = vcmask 261120   ;;  %vm97_vm5 = vcmp.ge.s32.totalorder %v1230_v32, 0  ;;  %v120_v40 = vsel %vm119_vm1, %v117_v17, %v118_v28  ;;  %v948_v58 = vld [vmem:[%s1480_s2 + $0x4] sm:$0xf]  ;;  %s925_s27 = sshll.u32 %s1123_s26, 4  ;;  %s926_s27 = int_to_ptr.vmem [resolvable:$true] %s925_s27 }
   0xc   :  { %v144_v37 = vmax.f32 %v111_v33, %v122_v30  ;;  %v145_v38 = vmax.f32 %v112_v22, %v141_v36  ;;  %v109_v39 = vsel %vm97_vm5, %v88_v35, -inf  ;;  %v114_v42 = vmax.f32 %v87_v34, %v1187_v7  ;;  %v941_v62 = vld [vmem:[%s1482_s4] ss:$0 sm:$0xff]  ;;  %p1104_p1 = scmp.lt.s32.totalorder %s926_s27, %s926_s27 }
   0xd   :  { %v113_v41 = vmax.f32 %v109_v39, %v1180_v5  ;;  %v123_v43 = vsel %vm119_vm1, %v118_v28, %v115_v10  ;;  %v1250_v44 = vadd.s32 1, %v1228_v31  ;;  %v229_v49 = vpack.c.bf16 %v1175_v4, %v1170_v3 }
   0xe   :  { %v148_v45 = vpack.c.bf16 %v145_v38, %v144_v37  ;;  %v230_v52 = vpack.c.bf16 %v1187_v7, %v1180_v5  ;;  %vm348_vm7 = vcmask 1043456   ;;  %v318_v59 = vadd.s32 4294967293, %v1198_v14 }
   0xf   :  { %vm135_vm6 = vcmp.lt.s32.totalorder %v1250_v44, 16  ;;  %v146_v46 = vmax.f32 %v113_v41, %v120_v40  ;;  %1087 = vmatprep.subr.msk.bf16.mxu0 %vm348_vm7, %v951_v53  ;;  %v523_v55 = vsel %vm348_vm7, %v951_v53, 0  ;;  %v350_v56 = vsel %vm348_vm7, %v340_v54, 0 }
  0x10   :  { %999 = vmatprep.mubr.msk.bf16.mxu1 %vm1485_vm4, %v148_v45  ;;  %v143_v47 = vsel %vm135_vm6, %v123_v43, -inf  ;;  %1024 = vmatpush3.bf16.msra.mxu0 %v523_v55  ;;  %v320_v60 = vadd.s32 4294967293, %v52_v25  ;;  %v1286_v61 = vadd.s32 4294967294, %v1198_v14  ;;  %v1291_v63 = vadd.s32 4294967294, %v52_v25  ;;  %v957_v55 = vld [vmem:[%s1480_s2 + $0x10] sm:$0xf] }
  0x11   :  { %v147_v48 = vmax.f32 %v114_v42, %v143_v47  ;;  %1088 = vmatprep.subr.msk.bf16.mxu0 %vm348_vm7, %v954_v57  ;;  %vm313_vm8 = vcmp.lt.s32.totalorder %v1182_v6, 3  ;;  %vm322_vm9 = vcmp.ge.s32.totalorder %v318_v59, 0  ;;  %vm341_vm10 = vcmask 64512  }
  0x12   :  { %vm324_vm11 = vcmp.ge.s32.totalorder %v320_v60, 0  ;;  %vm409_vm12 = vcmp.lt.s32.totalorder %v1182_v6, 2  ;;  %vm418_vm13 = vcmp.ge.s32.totalorder %v1286_v61, 0  ;;  %v1299_v3 = vsel %vm348_vm7, %v954_v57, 0 }
  0x13   :  { %v149_v50 = vpack.c.bf16 %v147_v48, %v146_v46  ;;  %v1302_v4 = vsel %vm348_vm7, %v948_v58, 0  ;;  %v1305_v5 = vadd.s32 2, %v1228_v31  ;;  %vm420_vm14 = vcmp.ge.s32.totalorder %v1291_v63, 0 }
  0x14   :  { %v1311_v9 = vadd.s32 2, %v1207_v19  ;;  %v1314_v10 = vadd.s32 3, %v1207_v19  ;;  %v1317_v11 = vadd.s32 3, %v1228_v31  ;;  %vm821_vm15 = vcmp.lt.s32.totalorder %v1182_v6, 5 }
  0x15   :  { %1000 = vmatmul.mubr.msk.bf16.vlgmr.msra.gmra.mrb[0].mxu1 %vm1485_vm4, %v149_v50 }
  0x16   :  { %1004 = vmatpush3.bf16.msra.mxu1 %v1097_v12  ;;  %1007 = vmatprep.mubr.msk.bf16.mxu1 %vm1485_vm4, %v229_v49 }
  0x17   :  { %1005 = vmatprep.subr.bf16.mxu1 %v1098_v51 }
  0x1a   :  { %1006 = vmatpush3.bf16.msra.mxu1 %v1098_v51 }
  0x1b   :  { %1085 = vmatprep.subr.msk.bf16.mxu1 %vm348_vm7, %v340_v54 }
  0x1d   :  { %1008 = vmatmul.mubr.msk.bf16.vlgmr.msra.gmra.mrb[4].mxu1 %vm1485_vm4, %v230_v52  ;;  %vm742_vm4 = vcmp.lt.s32.totalorder %v1305_v5, 16 }
  0x1e   :  { %1012 = vmatpush3.bf16.msra.mxu1 %v350_v56 }
  0x1f   :  { %1086 = vmatprep.subr.msk.bf16.mxu1 %vm348_vm7, %v948_v58 }
  0xf0   :  { %v1009_v0 = vpop.f32.mrb[4].mxu1 }
  0xf1   :  { %v1296_v1 = vadd.f32 %v1009_v0, %v941_v62  ;;  %v294_v2 = vpop.f32.mrb[5].mxu1 }
  0xf2   :  { %v1307_v7 = vadd.f32 %v941_v62, %v294_v2  ;;  %v1010_v8 = vpop.f32.mrb[6].mxu1 }
  0xf3   :  { %v1319_v12 = vadd.f32 %v1010_v8, %v941_v62  ;;  %v297_v13 = vpop.f32.mrb[7].mxu1  ;;  %v311_v14 = vrot.slane %v1296_v1, 5  ;;  %v502_v15 = vrot.slane %v1296_v1, 7  ;;  %v407_v16 = vrot.slane %v1296_v1, 6 }
  0xf4   :  { %v1324_v17 = vadd.f32 %v941_v62, %v297_v13  ;;  %v309_v18 = vrot.slane %v1307_v7, 5  ;;  %v500_v20 = vrot.slane %v1307_v7, 7  ;;  %v405_v19 = vrot.slane %v1307_v7, 6 }
  0xf5   :  { %v312_v22 = vrot.slane %v1319_v12, 5  ;;  %v503_v23 = vrot.slane %v1319_v12, 7  ;;  %v408_v24 = vrot.slane %v1319_v12, 6  ;;  %v579_v25 = vpack.c.bf16 %v1319_v12, %v1296_v1 }
  0xf6   :  { %v310_v27 = vrot.slane %v1324_v17, 5  ;;  %v501_v28 = vrot.slane %v1324_v17, 7  ;;  %v406_v29 = vrot.slane %v1324_v17, 6  ;;  %v578_v30 = vpack.c.bf16 %v1324_v17, %v1307_v7 }
  0xf7   :  { %v317_v31 = vsel %vm313_vm8, %v312_v22, %v309_v18  ;;  %v507_v33 = vsel %vm86_vm0, %v503_v23, %v500_v20  ;;  %v314_v34 = vsel %vm313_vm8, %v311_v14, %v312_v22  ;;  %v504_v35 = vsel %vm86_vm0, %v502_v15, %v503_v23 }
  0xf8   :  { %v316_v36 = vsel %vm313_vm8, %v309_v18, %v310_v27  ;;  %v334_v37 = vsel %vm322_vm9, %v317_v31, 0.0  ;;  %v506_v38 = vsel %vm86_vm0, %v500_v20, %v501_v28  ;;  %v508_v39 = vsel %vm95_vm2, %v507_v33, 0.0 }
  0xf9   :  { %v338_v40 = vpack.c.bf16 %v316_v36, %v334_v37  ;;  %v512_v41 = vpack.c.bf16 %v506_v38, %v508_v39  ;;  %v315_v42 = vsel %vm313_vm8, %v310_v27, %v311_v14  ;;  %v505_v43 = vsel %vm86_vm0, %v501_v28, %v502_v15  ;;  %v936_v38 = vld [vmem:[%s1483_s5] ss:$0 sm:$0xff]  ;;  %s1099_s5 = scalar_lea.vmem %s926_s27, 512 }
  0xfa   :  { %v336_v45 = vsel %vm324_vm11, %v315_v42, 0.0  ;;  %v510_v46 = vsel %vm97_vm5, %v505_v43, 0.0  ;;  %v412_v21 = vsel %vm409_vm12, %v405_v19, %v406_v29  ;;  %v413_v47 = vsel %vm409_vm12, %v408_v24, %v405_v19  ;;  %p1100_p0 = scmp.ne.s32.totalorder %s926_s27, %s1099_s5  ;;  %p1105_p2 = scmp.lt.s32.totalorder %s1099_s5, %s1099_s5 }
  0xfb   :  { %1013 = vmatprep.mubr.msk.bf16.mxu1 %vm341_vm10, %v338_v40  ;;  %1025 = vmatprep.mubr.msk.bf16.mxu0 %vm341_vm10, %v512_v41  ;;  %v339_v48 = vpack.c.bf16 %v314_v34, %v336_v45  ;;  %v513_v49 = vpack.c.bf16 %v504_v35, %v510_v46  ;;  %v430_v50 = vsel %vm418_vm13, %v413_v47, 0.0  ;;  %v410_v51 = vsel %vm409_vm12, %v407_v16, %v408_v24  ;;  %v960_v35 = vld [vmem:[%s1480_s2 + $0x14] sm:$0xf] }
  0xfc   :  { %vm837_vm0 = vcmp.lt.s32.totalorder %v1317_v11, 16  ;;  %v434_v32 = vpack.c.bf16 %v412_v21, %v430_v50  ;;  %v411_v52 = vsel %vm409_vm12, %v406_v29, %v407_v16  ;;  %v644_v53 = vrot.slane %v1307_v7, 1  ;;  %v963_v11 = vld [vmem:[%s1480_s2 + $0x18] sm:$0xf]  ;;  %p1106_p3 = por %p1105_p2, %p1104_p1 }
  0xfd   :  { %v645_v54 = vrot.slane %v1324_v17, 1  ;;  %1014 = vmatmul.mubr.msk.bf16.vlgmr.msra.gmra.mrb[0].mxu1 %vm341_vm10, %v339_v48  ;;  %1026 = vmatmul.mubr.msk.bf16.vlgmr.msra.gmra.mrb[0].mxu0 %vm341_vm10, %v513_v49  ;;  %v432_v56 = vsel %vm420_vm14, %v411_v52, 0.0  ;;  %v646_v57 = vrot.slane %v1296_v1, 1  ;;  %v647_v58 = vrot.slane %v1319_v12, 1 }
  0xfe   :  { %v722_v59 = vrot.slane %v1307_v7, 2  ;;  %1030 = vmatpush3.bf16.msra.mxu0 %v1299_v3  ;;  %1019 = vmatprep.mubr.msk.bf16.mxu1 %vm341_vm10, %v434_v32  ;;  %v435_v60 = vpack.c.bf16 %v410_v51, %v432_v56  ;;  %v723_v62 = vrot.slane %v1324_v17, 2  ;;  %v724_v0 = vrot.slane %v1296_v1, 2  ;;  %p1107_p4 = pnand %p1106_p3, %p1100_p0 }
  0xff   :  { %v650_v61 = vsel %vm119_vm1, %v644_v53, %v645_v54  ;;  %1031 = vmatprep.mubr.msk.bf16.mxu0 %vm341_vm10, %v578_v30  ;;  %1018 = vmatpush3.bf16.msra.mxu1 %v1302_v4  ;;  %v649_v63 = vsel %vm119_vm1, %v645_v54, %v646_v57  ;;  %v648_v2 = vsel %vm119_vm1, %v646_v57, %v647_v58  ;;  %v725_v8 = vrot.slane %v1319_v12, 2 }
 0x100   :  { %v651_v3 = vsel %vm119_vm1, %v647_v58, %v644_v53  ;;  %1089 = vmatprep.subr.msk.bf16.mxu0 %vm348_vm7, %v957_v55  ;;  %v653_v13 = vsel %vm133_vm3, %v649_v63, 0.0  ;;  %vm1486_vm2 = vcmp.lt.s32.totalorder %v1182_v6, 6  ;;  %vm1488_vm1 = vcmp.lt.s32.totalorder %v1311_v9, 16 }
 0x101   :  { %v655_v14 = vsel %vm135_vm6, %v651_v3, 0.0  ;;  %v728_v4 = vsel %vm1486_vm2, %v723_v62, %v724_v0  ;;  %vm1487_vm5 = vmmov %vm1486_vm2  ;;  %v656_v16 = vpack.c.bf16 %v653_v13, %v650_v61  ;;  %v817_v44 = vrot.slane %v1307_v7, 3 }
 0x102   :  { %v729_v15 = vsel %vm1487_vm5, %v722_v59, %v723_v62  ;;  %v657_v18 = vpack.c.bf16 %v655_v14, %v648_v2  ;;  %v748_v20 = vsel %vm1488_vm1, %v728_v4, 0.0  ;;  %vm1489_vm8 = vmmov %vm1486_vm2  ;;  %v818_v23 = vrot.slane %v1324_v17, 3 }
 0x103   :  { %v727_v19 = vsel %vm1489_vm8, %v724_v0, %v725_v8  ;;  %v751_v22 = vpack.c.bf16 %v748_v20, %v729_v15  ;;  %vm1490_vm3 = vmmov %vm1486_vm2  ;;  %v819_v27 = vrot.slane %v1296_v1, 3  ;;  %vm835_vm6 = vcmp.lt.s32.totalorder %v1314_v10, 16 }
 0x104   :  { %v730_v26 = vsel %vm1490_vm3, %v725_v8, %v722_v59  ;;  %v820_v9 = vrot.slane %v1319_v12, 3  ;;  %v824_v29 = vsel %vm821_vm15, %v817_v44, %v818_v23  ;;  %v667_v10 = vsel %vm348_vm7, %v957_v55, 0 }
 0x105   :  { %v750_v24 = vsel %vm742_vm4, %v730_v26, 0.0  ;;  %v823_v30 = vsel %vm821_vm15, %v818_v23, %v819_v27  ;;  %v762_v6 = vsel %vm348_vm7, %v960_v35, 0  ;;  %v857_v1 = vsel %vm348_vm7, %v963_v11, 0 }
 0x106   :  { %v752_v28 = vpack.c.bf16 %v750_v24, %v727_v19  ;;  %v822_v7 = vsel %vm821_vm15, %v819_v27, %v820_v9  ;;  %v825_v5 = vsel %vm821_vm15, %v820_v9, %v817_v44  ;;  %v843_v17 = vsel %vm835_vm6, %v823_v30, 0.0 }
 0x107   :  { %v845_v31 = vsel %vm837_vm0, %v825_v5, 0.0  ;;  %v846_v33 = vpack.c.bf16 %v843_v17, %v824_v29  ;;  %vm1491_vm4 = vcmask 261120  }
 0x108   :  { %v847_v34 = vpack.c.bf16 %v845_v31, %v822_v7  ;;  %vm1493_vm9 = vmmov %vm1491_vm4 }
 0x109   :  { %1020 = vmatmul.mubr.msk.bf16.vlgmr.msra.gmra.mrb[0].mxu1 %vm341_vm10, %v435_v60  ;;  %1032 = vmatmul.mubr.msk.bf16.vlgmr.msra.gmra.mrb[0].mxu0 %vm341_vm10, %v579_v25 }
 0x10a   :  { %1036 = vmatpush3.bf16.msra.mxu0 %v667_v10  ;;  %1037 = vmatprep.mubr.msk.bf16.mxu0 %vm341_vm10, %v656_v16 }
 0x10b   :  { %1090 = vmatprep.subr.msk.bf16.mxu0 %vm348_vm7, %v960_v35 }
 0x115   :  { %1038 = vmatmul.mubr.msk.bf16.vlgmr.msra.gmra.mrb[0].mxu0 %vm341_vm10, %v657_v18 }
 0x116   :  { %1042 = vmatpush3.bf16.msra.mxu0 %v762_v6  ;;  %1043 = vmatprep.mubr.msk.bf16.mxu0 %vm341_vm10, %v751_v22 }
 0x117   :  { %1091 = vmatprep.subr.msk.bf16.mxu0 %vm348_vm7, %v963_v11  ;;  %vm1492_vm7 = vmmov %vm1491_vm4 }
 0x121   :  { %1044 = vmatmul.mubr.msk.bf16.vlgmr.msra.gmra.mrb[0].mxu0 %vm341_vm10, %v752_v28 }
 0x122   :  { %1048 = vmatpush3.bf16.msra.mxu0 %v857_v1  ;;  %1049 = vmatprep.mubr.msk.bf16.mxu0 %vm341_vm10, %v846_v33 }
 0x12d   :  { %1050 = vmatmul.mubr.msk.bf16.vlgmr.msra.gmra.mrb[0].mxu0 %vm341_vm10, %v847_v34  ;;  %vm1494_vm10 = vmmov %vm1491_vm4 }
 0x1dc   :  { %v1021_v12 = vpop.f32.mrb[0].mxu1 }
 0x1dd   :  { %v481_v25 = vpop.f32.mrb[1].mxu1  ;;  %v1053_v39 = vadd.f32 %v1021_v12, %v936_v38 }
 0x1de   :  { %v1022_v36 = vpop.f32.mrb[2].mxu1  ;;  %v1055_v40 = vadd.f32 %v936_v38, %v481_v25 }
 0x1df   :  { %v484_v37 = vpop.f32.mrb[3].mxu1  ;;  %v1057_v42 = vadd.f32 %v1022_v36, %v936_v38 }
 0x1e0   :  { %v1059_v46 = vadd.f32 %v936_v38, %v484_v37 }
 0x200   :  { %v1051_v41 = vpop.f32.mrb[0].mxu0 }
 0x201   :  { %v1054_v43 = vadd.f32 %v1053_v39, %v1051_v41  ;;  %v893_v45 = vpop.f32.mrb[1].mxu0 }
 0x202   :  { %v1056_v21 = vadd.f32 %v1055_v40, %v893_v45  ;;  %v1052_v47 = vpop.f32.mrb[2].mxu0 }
 0x203   :  { %v914_v48 = vmax.f32 %v1054_v43, 0.0  ;;  %v1058_v49 = vadd.f32 %v1057_v42, %v1052_v47  ;;  %v896_v50 = vpop.f32.mrb[3].mxu0 }
 0x204   :  { %v912_v51 = vmax.f32 %v1056_v21, 0.0  ;;  %v1060_v32 = vadd.f32 %v1059_v46, %v896_v50 }
 0x205   :  { %918 = vst.msk [vmem:[#allocation2 + $0x10] sm:$0xff] %vm1491_vm4, %v914_v48  ;;  %v915_v52 = vmax.f32 %v1058_v49, 0.0 }
 0x206   :  { %916 = vst.msk [vmem:[#allocation2] sm:$0xff] %vm1492_vm7, %v912_v51  ;;  %v913_v53 = vmax.f32 %v1060_v32, 0.0 }
 0x207   :  { %919 = vst.msk [vmem:[#allocation2 + $0x18] sm:$0xff] %vm1493_vm9, %v915_v52 }
 0x208   :  { %917 = vst.msk [vmem:[#allocation2 + $0x8] sm:$0xff] %vm1494_vm10, %v913_v53 }
 0x209   :  { %1110 = shalt.err (!%p1107_p4)
}
 0x20a   :  { %s1111_s30 = scalar_lea.hbm %s1484_s6, 512 }
 0x20b   :  { %p1112_p5 = scmp.ne.s32.totalorder %s1484_s6, %s1111_s30  ;;  %p1115_p6 = scmp.lt.u32.totalorder %s1111_s30, %s1484_s6 }
 0x20d   :  { %p1117_p7 = pnand %p1115_p6, %p1112_p5 }
 0x20f   :  { %1120 = shalt.err (!%p1117_p7)
}
 0x210   :  { %s1124_s0 = smov 128   ;;  %s1125_s10 = smov 8  }
 0x211   :  { %931 = dma.vmem_to_hbm [thread:$0]  %s926_s27, 512, %s1484_s6, [#allocation3], %s1124_s0, %s1124_s0, %s1125_s10  }
 0x212   :  { %1121 = dma.done.wait [#allocation3], 512  }
 0x213   :  { %1122 = vsyncadd [#allocation3], 4294966784 }
 0x214   :  { %935 = vsyncpa [#allocation3], 1 }

</bundles_post_ra>
